<compile_context>
chip_gen: v7x
topology: tpu7x:2x2x1
jax: 0.10.0
libtpu: 0.0.40
codegen_flags: <defaults>
</compile_context>

<pallas_src>
import functools

import jax
import jax.numpy as jnp
from jax.experimental import pallas as pl
from jax.experimental.pallas import tpu as pltpu


# ----------------------------------------------------------------------------- helpers
def _vmem_limit_bytes():
    """Generation-aware VMEM budget: ~3/4 of physical VMEM (v7x: 48 MiB, v5e/v6e: ~96 MiB)."""
    try:
        cap = int(getattr(pltpu.get_tpu_info(), "vmem_capacity_bytes", 0))
    except Exception:
        cap = 0
    if cap <= 0:
        return 48 * 1024 * 1024            # safe on every generation (v7x has 64 MiB)
    return int(min(cap * 3 // 4, 100 * 1024 * 1024))


def _pick_t_block(T, V, vmem_budget):
    """Largest divisor Tb of T whose Tb*V lane tile is dense (multiple of 128, or the
    full T*V) and whose block-diagonal adjacency block (Tb*V)^2 f32 (double-buffered)
    stays well inside the VMEM budget."""
    best = None
    for tb in range(1, T + 1):
        if T % tb:
            continue
        tvb = tb * V
        if tvb % 128 != 0 and tvb != T * V:
            continue                       # keep matmul lanes / output stores dense
        if 2 * 4 * tvb * tvb > vmem_budget // 4:
            continue                       # A_bd block must not eat the VMEM budget
        best = tb
    if best is None:
        # TODO(synk): pad V up to a lane multiple for general (non power-of-two) V so
        # output stores stay unmasked (lane-dense out_spec) instead of this fallback.
        best = T
    return best


def _pick_batch_block(N, C_in, C_out, tvb, itemsize, vmem_budget):
    """Largest divisor Nb of N such that the flattened (Nb*C_in / Nb*C_out) row blocks
    satisfy the (8,128) sublane rule, the double-buffered x/out tiles fit the VMEM
    budget, Nb*C_in <= 256 (one v6e/v7x MXU pass), and >= 2 grid steps remain on the
    batch axis (megacore) whenever possible."""
    def aligned(nb):
        return ((nb * C_in) % 8 == 0 and (nb * C_out) % 8 == 0) or nb == N

    def fits(nb):
        tile_bytes = 2 * nb * tvb * (C_in * itemsize + C_out * 4)   # dbl-buffered in+out
        return tile_bytes <= vmem_budget // 4

    divisors = [nb for nb in range(1, N + 1) if N % nb == 0]
    pref = [nb for nb in divisors
            if aligned(nb) and fits(nb) and nb * C_in <= 256
            and (N == 1 or N // nb >= 2)]
    if pref:
        return max(pref)
    ok = [nb for nb in divisors if aligned(nb) and fits(nb)]
    if ok:
        return max(ok)
    return N


# ----------------------------------------------------------------------------- kernel
def _ctg_kernel(x_ref, abd_ref, w_ref, beff_ref, o_ref, *, nb, c_in, c_out):
    # x_ref:    (Nb*C_in,  TVb)  rows = (sample b, in-channel ci), lanes = (t, v)
    # abd_ref:  (TVb, TVb)       block-diagonal adjacency for this T-block
    # w_ref:    (C_out, C_in)    1x1 conv weight (grid-invariant, VMEM resident)
    # beff_ref: (C_out, TVb)     folded bias  b[c] * sum_v A[t, v, w]   (f32)
    # o_ref:    (Nb*C_out, TVb)  rows = (sample b, out-channel co), lanes = (t, w)

    # Graph contraction for ALL fused samples in one big MXU matmul (f32 accumulation).
    z = jnp.dot(x_ref[...], abd_ref[...], preferred_element_type=jnp.float32)

    # Channel mix C_in -> C_out on the VPU: C_in broadcast-FMAs per sample.  An
    # (M=C_out, K=C_in) MXU pass would be nearly empty at these channel counts, and
    # staying in f32 here removes the bf16 double-rounding of the previous version.
    w = w_ref[...].astype(jnp.float32)                       # (C_out, C_in)
    beff = beff_ref[...]                                     # (C_out, TVb), f32
    w_cols = [w[:, ci][:, None] for ci in range(c_in)]       # hoisted lane-broadcasts
    for b in range(nb):                                      # static unroll (small Nb)
        acc = beff                                           # bias already folded in
        for ci in range(c_in):
            acc = acc + w_cols[ci] * z[b * c_in + ci, :][None, :]
        o_ref[pl.ds(b * c_out, c_out), :] = acc.astype(o_ref.dtype)


# ----------------------------------------------------------------------------- wrapper
def make_conv_temporal_graphical(A, weight, bias, *, compute_dtype=None):
    """Build the forward pass once per model.

    A: (T, V, V); weight: (C_out, C_in); bias: (C_out,).  The derived constants
    (per-T-block block-diagonal adjacency, folded bias) depend only on parameters,
    so they are precomputed here instead of on every forward call.
    Returns forward(x) with x: (N, C_in, T, V) -> (out (N, C_out, T, V), A).
    """
    T, V, V2 = A.shape
    assert V == V2
    C_out, C_in = weight.shape
    f32 = jnp.float32

    vmem_budget = _vmem_limit_bytes()
    Tb = _pick_t_block(T, V, vmem_budget)
    n_tb = T // Tb
    TVb = Tb * V

    # Folded bias: b_eff[c, t*V + w] = bias[c] * sum_v A[t, v, w]   (kept in f32).
    b_eff = (bias.astype(f32)[:, None, None]
             * jnp.sum(A.astype(f32), axis=1)[None]).reshape(C_out, T * V)

    # Per-T-block block-diagonal adjacency:
    #   A_bd[g, t*V + v, t'*V + w] = (t == t') * A[g*Tb + t, v, w]
    A_r = A.reshape(n_tb, Tb, V, V)
    A_bd = (jnp.eye(Tb, dtype=A.dtype)[None, :, None, :, None]
            * A_r[:, :, :, None, :]).reshape(n_tb, TVb, TVb)

    mxu_dtype = compute_dtype
    if mxu_dtype is not None:
        A_bd = A_bd.astype(mxu_dtype)

    def forward(x):
        N, c_in_x, t_x, v_x = x.shape
        # mirrors the module's `assert A.size(0) == self.kernel_size`; the einsum
        # 'nctv,tvw->nctw' additionally requires kernel_size == T.
        assert (c_in_x, t_x, v_x) == (C_in, T, V)
        out_dtype = x.dtype

        # Free, contiguous reshape (no transpose): rows = (n, c_in), lanes = (t, v).
        x_flat = x.reshape(N * C_in, T * V)
        if mxu_dtype is not None:
            x_flat = x_flat.astype(mxu_dtype)

        Nb = _pick_batch_block(N, C_in, C_out, TVb, x_flat.dtype.itemsize, vmem_budget)
        grid = (N // Nb, n_tb)
        kernel = functools.partial(_ctg_kernel, nb=Nb, c_in=C_in, c_out=C_out)

        def build(single_buffer):
            def spec(block_shape, index_map, invariant):
                if single_buffer and invariant:
                    # Grid-invariant operand: one VMEM buffer instead of two.
                    return pl.BlockSpec(block_shape, index_map,
                                        pipeline_mode=pl.Buffered(1))
                return pl.BlockSpec(block_shape, index_map)

            t_inv = (n_tb == 1)   # A_bd / b_eff only grid-constant with a single T block
            return pl.pallas_call(
                kernel,
                out_shape=jax.ShapeDtypeStruct((N * C_out, T * V), out_dtype),
                grid_spec=pltpu.PrefetchScalarGridSpec(
                    num_scalar_prefetch=0,
                    grid=grid,
                    in_specs=[
                        pl.BlockSpec((Nb * C_in, TVb), lambda g, t: (g, t)),        # x
                        spec((None, TVb, TVb), lambda g, t: (t, 0, 0), t_inv),      # A_bd
                        spec((C_out, C_in), lambda g, t: (0, 0), True),             # W
                        spec((C_out, TVb), lambda g, t: (0, t), t_inv),             # b_eff
                    ],
                    out_specs=pl.BlockSpec((Nb * C_out, TVb), lambda g, t: (g, t)),
                ),
                compiler_params=pltpu.CompilerParams(
                    # Both axes write disjoint output tiles -> fully parallel;
                    # megacore shards them across TensorCores on v7x.
                    dimension_semantics=("parallel", "parallel"),
                    vmem_limit_bytes=vmem_budget,
                ),
            )

        try:
            out_flat = build(True)(x_flat, A_bd, weight, b_eff)
        except Exception:
            # Installed JAX rejects per-BlockSpec pipeline_mode: fall back to plain
            # specs (identical math; invariant operands just stay double-buffered).
            out_flat = build(False)(x_flat, A_bd, weight, b_eff)

        out = out_flat.reshape(N, C_out, T, V)     # free, contiguous reshape back
        # TODO(synk): fuse with the following ST-GCN temporal-conv/BN/ReLU (or emit
        # bf16 activations) to avoid the HBM round trip of this DMA-bound output.
        return out, A

    return forward


def conv_temporal_graphical(x, A, weight, bias, *, compute_dtype=None):
    """One-shot convenience wrapper (prefer make_conv_temporal_graphical + reuse)."""
    return make_conv_temporal_graphical(A, weight, bias,
                                        compute_dtype=compute_dtype)(x)


# ----------------------------------------------------------------------------- demo
if __name__ == "__main__":
    # Small shapes consistent with the forward: A.shape[0] (== kernel_size) must equal
    # T for the einsum, and T*V = 128 keeps every tile lane-dense.  N=8 exercises the
    # batch-fused grid (Nb=4 samples per step, 2 parallel grid steps).
    N, C_in, C_out, T, V = 8, 4, 8, 8, 16

    key = jax.random.PRNGKey(0)
    kx, ka, kw, kb = jax.random.split(key, 4)
    x = jax.random.normal(kx, (N, C_in, T, V), dtype=jnp.float32)
    A = jax.random.normal(ka, (T, V, V), dtype=jnp.float32)
    # Synthetic parameters for Conv2d(C_in, C_out, kernel=(1,1), bias=True).
    weight = jax.random.normal(kw, (C_out, C_in), dtype=jnp.float32) * 0.1
    bias = jax.random.normal(kb, (C_out,), dtype=jnp.float32) * 0.1

    fwd = make_conv_temporal_graphical(A, weight, bias)     # constants built once
    out, newA = fwd(x)
    out = jax.block_until_ready(out)

    # Pure-JAX reference of the module's forward.
    y_ref = jnp.einsum('oi,nitv->notv', weight, x) + bias[None, :, None, None]
    ref = jnp.einsum('nctv,tvw->nctw', y_ref, A)
    assert out.shape == (N, C_out, T, V)
    assert jnp.allclose(out, ref, atol=1e-4, rtol=1e-4)
    assert jnp.array_equal(newA, A)

    # bf16 MXU path: graph contraction in bf16 with f32 accumulation; the channel mix
    # and bias stay in f32 (no double rounding of z).
    out_bf16, _ = conv_temporal_graphical(x, A, weight, bias, compute_dtype=jnp.bfloat16)
    out_bf16 = jax.block_until_ready(out_bf16)
    assert out_bf16.shape == (N, C_out, T, V)
    assert jnp.allclose(out_bf16, ref, atol=0.2, rtol=0.2)

    print("KERNEL_OK")
</pallas_src>

<mosaic_0001>
module attributes {stable_mosaic.version = 11 : i64} {
  func.func @_ctg_kernel(%arg0: i32, %arg1: i32, %arg2: memref<16x128xf32, #tpu.memory_space<vmem>>, %arg3: memref<1x128x128xf32, #tpu.memory_space<vmem>>, %arg4: memref<8x4xf32, #tpu.memory_space<vmem>>, %arg5: memref<8x128xf32, #tpu.memory_space<vmem>>, %arg6: memref<32x128xf32, #tpu.memory_space<vmem>>) attributes {dimension_semantics = [#tpu.dimension_semantics<parallel>, #tpu.dimension_semantics<parallel>], iteration_bounds = array<i64: 2, 1>, scalar_prefetch = 0 : i64, scratch_operands = 0 : i64, tpu.core_type = #tpu.core_type<tc>, window_params = [{transform_indices = @transform_0, window_bounds = array<i64: 16, 128>}, {pipeline_mode = #tpu.pipeline_mode<synchronous>, transform_indices = @transform_1, window_bounds = array<i64: 1, 128, 128>}, {pipeline_mode = #tpu.pipeline_mode<synchronous>, transform_indices = @transform_2, window_bounds = array<i64: 8, 4>}, {pipeline_mode = #tpu.pipeline_mode<synchronous>, transform_indices = @transform_3, window_bounds = array<i64: 8, 128>}, {transform_indices = @transform_4, window_bounds = array<i64: 32, 128>}]} {
    %c0 = arith.constant 0 : index
    %c0_0 = arith.constant 0 : index
    %0 = vector.load %arg2[%c0, %c0_0] : memref<16x128xf32, #tpu.memory_space<vmem>>, vector<16x128xf32>
    %c0_1 = arith.constant 0 : index
    %c0_2 = arith.constant 0 : index
    %c0_3 = arith.constant 0 : index
    %1 = vector.load %arg3[%c0_1, %c0_2, %c0_3] : memref<1x128x128xf32, #tpu.memory_space<vmem>>, vector<1x128x128xf32>
    %2 = vector.shape_cast %1 : vector<1x128x128xf32> to vector<128x128xf32>
    %cst = arith.constant dense<0.000000e+00> : vector<16x128xf32>
    %3 = tpu.matmul %0, %2, %cst {dimension_numbers = #tpu.dot_dimension_numbers<[1], [0], [0], [1], [0, 0, 1, 1], [], []>} : vector<16x128xf32>, vector<128x128xf32>, vector<16x128xf32> -> vector<16x128xf32>
    %c0_4 = arith.constant 0 : index
    %c0_5 = arith.constant 0 : index
    %4 = vector.load %arg4[%c0_4, %c0_5] : memref<8x4xf32, #tpu.memory_space<vmem>>, vector<8x4xf32>
    %c0_6 = arith.constant 0 : index
    %c0_7 = arith.constant 0 : index
    %5 = vector.load %arg5[%c0_6, %c0_7] : memref<8x128xf32, #tpu.memory_space<vmem>>, vector<8x128xf32>
    %6 = vector.extract_strided_slice %4 {offsets = [0, 0], sizes = [8, 1], strides = [1, 1]} : vector<8x4xf32> to vector<8x1xf32>
    %7 = vector.shape_cast %6 : vector<8x1xf32> to vector<8xf32>
    %8 = vector.shape_cast %7 : vector<8xf32> to vector<8x1xf32>
    %9 = vector.extract_strided_slice %4 {offsets = [0, 1], sizes = [8, 1], strides = [1, 1]} : vector<8x4xf32> to vector<8x1xf32>
    %10 = vector.shape_cast %9 : vector<8x1xf32> to vector<8xf32>
    %11 = vector.shape_cast %10 : vector<8xf32> to vector<8x1xf32>
    %12 = vector.extract_strided_slice %4 {offsets = [0, 2], sizes = [8, 1], strides = [1, 1]} : vector<8x4xf32> to vector<8x1xf32>
    %13 = vector.shape_cast %12 : vector<8x1xf32> to vector<8xf32>
    %14 = vector.shape_cast %13 : vector<8xf32> to vector<8x1xf32>
    %15 = vector.extract_strided_slice %4 {offsets = [0, 3], sizes = [8, 1], strides = [1, 1]} : vector<8x4xf32> to vector<8x1xf32>
    %16 = vector.shape_cast %15 : vector<8x1xf32> to vector<8xf32>
    %17 = vector.shape_cast %16 : vector<8xf32> to vector<8x1xf32>
    %18 = vector.extract_strided_slice %3 {offsets = [0, 0], sizes = [1, 128], strides = [1, 1]} : vector<16x128xf32> to vector<1x128xf32>
    %19 = vector.shape_cast %18 : vector<1x128xf32> to vector<128xf32>
    %20 = vector.shape_cast %19 : vector<128xf32> to vector<1x128xf32>
    %21 = vector.broadcast %8 : vector<8x1xf32> to vector<8x128xf32>
    %22 = vector.broadcast %20 : vector<1x128xf32> to vector<8x128xf32>
    %23 = arith.mulf %21, %22 : vector<8x128xf32>
    %24 = arith.addf %5, %23 : vector<8x128xf32>
    %25 = vector.extract_strided_slice %3 {offsets = [1, 0], sizes = [1, 128], strides = [1, 1]} : vector<16x128xf32> to vector<1x128xf32>
    %26 = vector.shape_cast %25 : vector<1x128xf32> to vector<128xf32>
    %27 = vector.shape_cast %26 : vector<128xf32> to vector<1x128xf32>
    %28 = vector.broadcast %11 : vector<8x1xf32> to vector<8x128xf32>
    %29 = vector.broadcast %27 : vector<1x128xf32> to vector<8x128xf32>
    %30 = arith.mulf %28, %29 : vector<8x128xf32>
    %31 = arith.addf %24, %30 : vector<8x128xf32>
    %32 = vector.extract_strided_slice %3 {offsets = [2, 0], sizes = [1, 128], strides = [1, 1]} : vector<16x128xf32> to vector<1x128xf32>
    %33 = vector.shape_cast %32 : vector<1x128xf32> to vector<128xf32>
    %34 = vector.shape_cast %33 : vector<128xf32> to vector<1x128xf32>
    %35 = vector.broadcast %14 : vector<8x1xf32> to vector<8x128xf32>
    %36 = vector.broadcast %34 : vector<1x128xf32> to vector<8x128xf32>
    %37 = arith.mulf %35, %36 : vector<8x128xf32>
    %38 = arith.addf %31, %37 : vector<8x128xf32>
    %39 = vector.extract_strided_slice %3 {offsets = [3, 0], sizes = [1, 128], strides = [1, 1]} : vector<16x128xf32> to vector<1x128xf32>
    %40 = vector.shape_cast %39 : vector<1x128xf32> to vector<128xf32>
    %41 = vector.shape_cast %40 : vector<128xf32> to vector<1x128xf32>
    %42 = vector.broadcast %17 : vector<8x1xf32> to vector<8x128xf32>
    %43 = vector.broadcast %41 : vector<1x128xf32> to vector<8x128xf32>
    %44 = arith.mulf %42, %43 : vector<8x128xf32>
    %45 = arith.addf %38, %44 : vector<8x128xf32>
    %c0_8 = arith.constant 0 : index
    %c0_9 = arith.constant 0 : index
    %46 = vector.load %arg6[%c0_8, %c0_9] : memref<32x128xf32, #tpu.memory_space<vmem>>, vector<8x128xf32>
    tpu.vector_store %arg6[%c0_8, %c0_9], %45 {strides = array<i32>} : memref<32x128xf32, #tpu.memory_space<vmem>>, vector<8x128xf32>,
    %47 = vector.extract_strided_slice %3 {offsets = [4, 0], sizes = [1, 128], strides = [1, 1]} : vector<16x128xf32> to vector<1x128xf32>
    %48 = vector.shape_cast %47 : vector<1x128xf32> to vector<128xf32>
    %49 = vector.shape_cast %48 : vector<128xf32> to vector<1x128xf32>
    %50 = vector.broadcast %8 : vector<8x1xf32> to vector<8x128xf32>
    %51 = vector.broadcast %49 : vector<1x128xf32> to vector<8x128xf32>
    %52 = arith.mulf %50, %51 : vector<8x128xf32>
    %53 = arith.addf %5, %52 : vector<8x128xf32>
    %54 = vector.extract_strided_slice %3 {offsets = [5, 0], sizes = [1, 128], strides = [1, 1]} : vector<16x128xf32> to vector<1x128xf32>
    %55 = vector.shape_cast %54 : vector<1x128xf32> to vector<128xf32>
    %56 = vector.shape_cast %55 : vector<128xf32> to vector<1x128xf32>
    %57 = vector.broadcast %11 : vector<8x1xf32> to vector<8x128xf32>
    %58 = vector.broadcast %56 : vector<1x128xf32> to vector<8x128xf32>
    %59 = arith.mulf %57, %58 : vector<8x128xf32>
    %60 = arith.addf %53, %59 : vector<8x128xf32>
    %61 = vector.extract_strided_slice %3 {offsets = [6, 0], sizes = [1, 128], strides = [1, 1]} : vector<16x128xf32> to vector<1x128xf32>
    %62 = vector.shape_cast %61 : vector<1x128xf32> to vector<128xf32>
    %63 = vector.shape_cast %62 : vector<128xf32> to vector<1x128xf32>
    %64 = vector.broadcast %14 : vector<8x1xf32> to vector<8x128xf32>
    %65 = vector.broadcast %63 : vector<1x128xf32> to vector<8x128xf32>
    %66 = arith.mulf %64, %65 : vector<8x128xf32>
    %67 = arith.addf %60, %66 : vector<8x128xf32>
    %68 = vector.extract_strided_slice %3 {offsets = [7, 0], sizes = [1, 128], strides = [1, 1]} : vector<16x128xf32> to vector<1x128xf32>
    %69 = vector.shape_cast %68 : vector<1x128xf32> to vector<128xf32>
    %70 = vector.shape_cast %69 : vector<128xf32> to vector<1x128xf32>
    %71 = vector.broadcast %17 : vector<8x1xf32> to vector<8x128xf32>
    %72 = vector.broadcast %70 : vector<1x128xf32> to vector<8x128xf32>
    %73 = arith.mulf %71, %72 : vector<8x128xf32>
    %74 = arith.addf %67, %73 : vector<8x128xf32>
    %c8 = arith.constant 8 : index
    %c0_10 = arith.constant 0 : index
    %75 = vector.load %arg6[%c8, %c0_10] : memref<32x128xf32, #tpu.memory_space<vmem>>, vector<8x128xf32>
    tpu.vector_store %arg6[%c8, %c0_10], %74 {strides = array<i32>} : memref<32x128xf32, #tpu.memory_space<vmem>>, vector<8x128xf32>,
    %76 = vector.extract_strided_slice %3 {offsets = [8, 0], sizes = [1, 128], strides = [1, 1]} : vector<16x128xf32> to vector<1x128xf32>
    %77 = vector.shape_cast %76 : vector<1x128xf32> to vector<128xf32>
    %78 = vector.shape_cast %77 : vector<128xf32> to vector<1x128xf32>
    %79 = vector.broadcast %8 : vector<8x1xf32> to vector<8x128xf32>
    %80 = vector.broadcast %78 : vector<1x128xf32> to vector<8x128xf32>
    %81 = arith.mulf %79, %80 : vector<8x128xf32>
    %82 = arith.addf %5, %81 : vector<8x128xf32>
    %83 = vector.extract_strided_slice %3 {offsets = [9, 0], sizes = [1, 128], strides = [1, 1]} : vector<16x128xf32> to vector<1x128xf32>
    %84 = vector.shape_cast %83 : vector<1x128xf32> to vector<128xf32>
    %85 = vector.shape_cast %84 : vector<128xf32> to vector<1x128xf32>
    %86 = vector.broadcast %11 : vector<8x1xf32> to vector<8x128xf32>
    %87 = vector.broadcast %85 : vector<1x128xf32> to vector<8x128xf32>
    %88 = arith.mulf %86, %87 : vector<8x128xf32>
    %89 = arith.addf %82, %88 : vector<8x128xf32>
    %90 = vector.extract_strided_slice %3 {offsets = [10, 0], sizes = [1, 128], strides = [1, 1]} : vector<16x128xf32> to vector<1x128xf32>
    %91 = vector.shape_cast %90 : vector<1x128xf32> to vector<128xf32>
    %92 = vector.shape_cast %91 : vector<128xf32> to vector<1x128xf32>
    %93 = vector.broadcast %14 : vector<8x1xf32> to vector<8x128xf32>
    %94 = vector.broadcast %92 : vector<1x128xf32> to vector<8x128xf32>
    %95 = arith.mulf %93, %94 : vector<8x128xf32>
    %96 = arith.addf %89, %95 : vector<8x128xf32>
    %97 = vector.extract_strided_slice %3 {offsets = [11, 0], sizes = [1, 128], strides = [1, 1]} : vector<16x128xf32> to vector<1x128xf32>
    %98 = vector.shape_cast %97 : vector<1x128xf32> to vector<128xf32>
    %99 = vector.shape_cast %98 : vector<128xf32> to vector<1x128xf32>
    %100 = vector.broadcast %17 : vector<8x1xf32> to vector<8x128xf32>
    %101 = vector.broadcast %99 : vector<1x128xf32> to vector<8x128xf32>
    %102 = arith.mulf %100, %101 : vector<8x128xf32>
    %103 = arith.addf %96, %102 : vector<8x128xf32>
    %c16 = arith.constant 16 : index
    %c0_11 = arith.constant 0 : index
    %104 = vector.load %arg6[%c16, %c0_11] : memref<32x128xf32, #tpu.memory_space<vmem>>, vector<8x128xf32>
    tpu.vector_store %arg6[%c16, %c0_11], %103 {strides = array<i32>} : memref<32x128xf32, #tpu.memory_space<vmem>>, vector<8x128xf32>,
    %105 = vector.extract_strided_slice %3 {offsets = [12, 0], sizes = [1, 128], strides = [1, 1]} : vector<16x128xf32> to vector<1x128xf32>
    %106 = vector.shape_cast %105 : vector<1x128xf32> to vector<128xf32>
    %107 = vector.shape_cast %106 : vector<128xf32> to vector<1x128xf32>
    %108 = vector.broadcast %8 : vector<8x1xf32> to vector<8x128xf32>
    %109 = vector.broadcast %107 : vector<1x128xf32> to vector<8x128xf32>
    %110 = arith.mulf %108, %109 : vector<8x128xf32>
    %111 = arith.addf %5, %110 : vector<8x128xf32>
    %112 = vector.extract_strided_slice %3 {offsets = [13, 0], sizes = [1, 128], strides = [1, 1]} : vector<16x128xf32> to vector<1x128xf32>
    %113 = vector.shape_cast %112 : vector<1x128xf32> to vector<128xf32>
    %114 = vector.shape_cast %113 : vector<128xf32> to vector<1x128xf32>
    %115 = vector.broadcast %11 : vector<8x1xf32> to vector<8x128xf32>
    %116 = vector.broadcast %114 : vector<1x128xf32> to vector<8x128xf32>
    %117 = arith.mulf %115, %116 : vector<8x128xf32>
    %118 = arith.addf %111, %117 : vector<8x128xf32>
    %119 = vector.extract_strided_slice %3 {offsets = [14, 0], sizes = [1, 128], strides = [1, 1]} : vector<16x128xf32> to vector<1x128xf32>
    %120 = vector.shape_cast %119 : vector<1x128xf32> to vector<128xf32>
    %121 = vector.shape_cast %120 : vector<128xf32> to vector<1x128xf32>
    %122 = vector.broadcast %14 : vector<8x1xf32> to vector<8x128xf32>
    %123 = vector.broadcast %121 : vector<1x128xf32> to vector<8x128xf32>
    %124 = arith.mulf %122, %123 : vector<8x128xf32>
    %125 = arith.addf %118, %124 : vector<8x128xf32>
    %126 = vector.extract_strided_slice %3 {offsets = [15, 0], sizes = [1, 128], strides = [1, 1]} : vector<16x128xf32> to vector<1x128xf32>
    %127 = vector.shape_cast %126 : vector<1x128xf32> to vector<128xf32>
    %128 = vector.shape_cast %127 : vector<128xf32> to vector<1x128xf32>
    %129 = vector.broadcast %17 : vector<8x1xf32> to vector<8x128xf32>
    %130 = vector.broadcast %128 : vector<1x128xf32> to vector<8x128xf32>
    %131 = arith.mulf %129, %130 : vector<8x128xf32>
    %132 = arith.addf %125, %131 : vector<8x128xf32>
    %c24 = arith.constant 24 : index
    %c0_12 = arith.constant 0 : index
    %133 = vector.load %arg6[%c24, %c0_12] : memref<32x128xf32, #tpu.memory_space<vmem>>, vector<8x128xf32>
    tpu.vector_store %arg6[%c24, %c0_12], %132 {strides = array<i32>} : memref<32x128xf32, #tpu.memory_space<vmem>>, vector<8x128xf32>,
    return
  }
  func.func @transform_0(%arg0: i32, %arg1: i32) -> (i32, i32) {
    %c0_i32 = arith.constant 0 : i32
    return %arg0, %arg1 : i32, i32
  }
  func.func @transform_1(%arg0: i32, %arg1: i32) -> (i32, i32, i32) {
    %c0_i32 = arith.constant 0 : i32
    %c0_i32_0 = arith.constant 0 : i32
    %c0_i32_1 = arith.constant 0 : i32
    return %arg1, %c0_i32, %c0_i32_0 : i32, i32, i32
  }
  func.func @transform_2(%arg0: i32, %arg1: i32) -> (i32, i32) {
    %c0_i32 = arith.constant 0 : i32
    %c0_i32_0 = arith.constant 0 : i32
    %c0_i32_1 = arith.constant 0 : i32
    return %c0_i32, %c0_i32_0 : i32, i32
  }
  func.func @transform_3(%arg0: i32, %arg1: i32) -> (i32, i32) {
    %c0_i32 = arith.constant 0 : i32
    %c0_i32_0 = arith.constant 0 : i32
    return %c0_i32, %arg1 : i32, i32
  }
  func.func @transform_4(%arg0: i32, %arg1: i32) -> (i32, i32) {
    %c0_i32 = arith.constant 0 : i32
    return %arg0, %arg1 : i32, i32
  }
}

module attributes {stable_mosaic.version = 11 : i64} {
  func.func @_ctg_kernel(%arg0: i32, %arg1: i32, %arg2: memref<16x128xf32, #tpu.memory_space<vmem>>, %arg3: memref<1x128x128xf32, #tpu.memory_space<vmem>>, %arg4: memref<8x4xf32, #tpu.memory_space<vmem>>, %arg5: memref<8x128xf32, #tpu.memory_space<vmem>>, %arg6: memref<32x128xf32, #tpu.memory_space<vmem>>) attributes {dimension_semantics = [#tpu.dimension_semantics<parallel>, #tpu.dimension_semantics<parallel>], iteration_bounds = array<i64: 2, 1>, scalar_prefetch = 0 : i64, scratch_operands = 0 : i64, tpu.core_type = #tpu.core_type<tc>, window_params = [{transform_indices = @transform_0, window_bounds = array<i64: 16, 128>}, {transform_indices = @transform_1, window_bounds = array<i64: 1, 128, 128>}, {pipeline_mode = #tpu.pipeline_mode<synchronous>, transform_indices = @transform_2, window_bounds = array<i64: 8, 4>}, {transform_indices = @transform_3, window_bounds = array<i64: 8, 128>}, {transform_indices = @transform_4, window_bounds = array<i64: 32, 128>}]} {
    %c0 = arith.constant 0 : index
    %c0_0 = arith.constant 0 : index
    %0 = vector.load %arg2[%c0, %c0_0] : memref<16x128xf32, #tpu.memory_space<vmem>>, vector<16x128xf32>
    %c0_1 = arith.constant 0 : index
    %c0_2 = arith.constant 0 : index
    %c0_3 = arith.constant 0 : index
    %1 = vector.load %arg3[%c0_1, %c0_2, %c0_3] : memref<1x128x128xf32, #tpu.memory_space<vmem>>, vector<1x128x128xf32>
    %2 = vector.shape_cast %1 : vector<1x128x128xf32> to vector<128x128xf32>
    %cst = arith.constant dense<0.000000e+00> : vector<16x128xf32>
    %3 = tpu.matmul %0, %2, %cst {dimension_numbers = #tpu.dot_dimension_numbers<[1], [0], [0], [1], [0, 0, 1, 1], [], []>} : vector<16x128xf32>, vector<128x128xf32>, vector<16x128xf32> -> vector<16x128xf32>
    %c0_4 = arith.constant 0 : index
    %c0_5 = arith.constant 0 : index
    %4 = vector.load %arg4[%c0_4, %c0_5] : memref<8x4xf32, #tpu.memory_space<vmem>>, vector<8x4xf32>
    %c0_6 = arith.constant 0 : index
    %c0_7 = arith.constant 0 : index
    %5 = vector.load %arg5[%c0_6, %c0_7] : memref<8x128xf32, #tpu.memory_space<vmem>>, vector<8x128xf32>
    %6 = vector.extract_strided_slice %4 {offsets = [0, 0], sizes = [8, 1], strides = [1, 1]} : vector<8x4xf32> to vector<8x1xf32>
    %7 = vector.shape_cast %6 : vector<8x1xf32> to vector<8xf32>
    %8 = vector.shape_cast %7 : vector<8xf32> to vector<8x1xf32>
    %9 = vector.extract_strided_slice %4 {offsets = [0, 1], sizes = [8, 1], strides = [1, 1]} : vector<8x4xf32> to vector<8x1xf32>
    %10 = vector.shape_cast %9 : vector<8x1xf32> to vector<8xf32>
    %11 = vector.shape_cast %10 : vector<8xf32> to vector<8x1xf32>
    %12 = vector.extract_strided_slice %4 {offsets = [0, 2], sizes = [8, 1], strides = [1, 1]} : vector<8x4xf32> to vector<8x1xf32>
    %13 = vector.shape_cast %12 : vector<8x1xf32> to vector<8xf32>
    %14 = vector.shape_cast %13 : vector<8xf32> to vector<8x1xf32>
    %15 = vector.extract_strided_slice %4 {offsets = [0, 3], sizes = [8, 1], strides = [1, 1]} : vector<8x4xf32> to vector<8x1xf32>
    %16 = vector.shape_cast %15 : vector<8x1xf32> to vector<8xf32>
    %17 = vector.shape_cast %16 : vector<8xf32> to vector<8x1xf32>
    %18 = vector.extract_strided_slice %3 {offsets = [0, 0], sizes = [1, 128], strides = [1, 1]} : vector<16x128xf32> to vector<1x128xf32>
    %19 = vector.shape_cast %18 : vector<1x128xf32> to vector<128xf32>
    %20 = vector.shape_cast %19 : vector<128xf32> to vector<1x128xf32>
    %21 = vector.broadcast %8 : vector<8x1xf32> to vector<8x128xf32>
    %22 = vector.broadcast %20 : vector<1x128xf32> to vector<8x128xf32>
    %23 = arith.mulf %21, %22 : vector<8x128xf32>
    %24 = arith.addf %5, %23 : vector<8x128xf32>
    %25 = vector.extract_strided_slice %3 {offsets = [1, 0], sizes = [1, 128], strides = [1, 1]} : vector<16x128xf32> to vector<1x128xf32>
    %26 = vector.shape_cast %25 : vector<1x128xf32> to vector<128xf32>
    %27 = vector.shape_cast %26 : vector<128xf32> to vector<1x128xf32>
    %28 = vector.broadcast %11 : vector<8x1xf32> to vector<8x128xf32>
    %29 = vector.broadcast %27 : vector<1x128xf32> to vector<8x128xf32>
    %30 = arith.mulf %28, %29 : vector<8x128xf32>
    %31 = arith.addf %24, %30 : vector<8x128xf32>
    %32 = vector.extract_strided_slice %3 {offsets = [2, 0], sizes = [1, 128], strides = [1, 1]} : vector<16x128xf32> to vector<1x128xf32>
    %33 = vector.shape_cast %32 : vector<1x128xf32> to vector<128xf32>
    %34 = vector.shape_cast %33 : vector<128xf32> to vector<1x128xf32>
    %35 = vector.broadcast %14 : vector<8x1xf32> to vector<8x128xf32>
    %36 = vector.broadcast %34 : vector<1x128xf32> to vector<8x128xf32>
    %37 = arith.mulf %35, %36 : vector<8x128xf32>
    %38 = arith.addf %31, %37 : vector<8x128xf32>
    %39 = vector.extract_strided_slice %3 {offsets = [3, 0], sizes = [1, 128], strides = [1, 1]} : vector<16x128xf32> to vector<1x128xf32>
    %40 = vector.shape_cast %39 : vector<1x128xf32> to vector<128xf32>
    %41 = vector.shape_cast %40 : vector<128xf32> to vector<1x128xf32>
    %42 = vector.broadcast %17 : vector<8x1xf32> to vector<8x128xf32>
    %43 = vector.broadcast %41 : vector<1x128xf32> to vector<8x128xf32>
    %44 = arith.mulf %42, %43 : vector<8x128xf32>
    %45 = arith.addf %38, %44 : vector<8x128xf32>
    %c0_8 = arith.constant 0 : index
    %c0_9 = arith.constant 0 : index
    %46 = vector.load %arg6[%c0_8, %c0_9] : memref<32x128xf32, #tpu.memory_space<vmem>>, vector<8x128xf32>
    tpu.vector_store %arg6[%c0_8, %c0_9], %45 {strides = array<i32>} : memref<32x128xf32, #tpu.memory_space<vmem>>, vector<8x128xf32>,
    %47 = vector.extract_strided_slice %3 {offsets = [4, 0], sizes = [1, 128], strides = [1, 1]} : vector<16x128xf32> to vector<1x128xf32>
    %48 = vector.shape_cast %47 : vector<1x128xf32> to vector<128xf32>
    %49 = vector.shape_cast %48 : vector<128xf32> to vector<1x128xf32>
    %50 = vector.broadcast %8 : vector<8x1xf32> to vector<8x128xf32>
    %51 = vector.broadcast %49 : vector<1x128xf32> to vector<8x128xf32>
    %52 = arith.mulf %50, %51 : vector<8x128xf32>
    %53 = arith.addf %5, %52 : vector<8x128xf32>
    %54 = vector.extract_strided_slice %3 {offsets = [5, 0], sizes = [1, 128], strides = [1, 1]} : vector<16x128xf32> to vector<1x128xf32>
    %55 = vector.shape_cast %54 : vector<1x128xf32> to vector<128xf32>
    %56 = vector.shape_cast %55 : vector<128xf32> to vector<1x128xf32>
    %57 = vector.broadcast %11 : vector<8x1xf32> to vector<8x128xf32>
    %58 = vector.broadcast %56 : vector<1x128xf32> to vector<8x128xf32>
    %59 = arith.mulf %57, %58 : vector<8x128xf32>
    %60 = arith.addf %53, %59 : vector<8x128xf32>
    %61 = vector.extract_strided_slice %3 {offsets = [6, 0], sizes = [1, 128], strides = [1, 1]} : vector<16x128xf32> to vector<1x128xf32>
    %62 = vector.shape_cast %61 : vector<1x128xf32> to vector<128xf32>
    %63 = vector.shape_cast %62 : vector<128xf32> to vector<1x128xf32>
    %64 = vector.broadcast %14 : vector<8x1xf32> to vector<8x128xf32>
    %65 = vector.broadcast %63 : vector<1x128xf32> to vector<8x128xf32>
    %66 = arith.mulf %64, %65 : vector<8x128xf32>
    %67 = arith.addf %60, %66 : vector<8x128xf32>
    %68 = vector.extract_strided_slice %3 {offsets = [7, 0], sizes = [1, 128], strides = [1, 1]} : vector<16x128xf32> to vector<1x128xf32>
    %69 = vector.shape_cast %68 : vector<1x128xf32> to vector<128xf32>
    %70 = vector.shape_cast %69 : vector<128xf32> to vector<1x128xf32>
    %71 = vector.broadcast %17 : vector<8x1xf32> to vector<8x128xf32>
    %72 = vector.broadcast %70 : vector<1x128xf32> to vector<8x128xf32>
    %73 = arith.mulf %71, %72 : vector<8x128xf32>
    %74 = arith.addf %67, %73 : vector<8x128xf32>
    %c8 = arith.constant 8 : index
    %c0_10 = arith.constant 0 : index
    %75 = vector.load %arg6[%c8, %c0_10] : memref<32x128xf32, #tpu.memory_space<vmem>>, vector<8x128xf32>
    tpu.vector_store %arg6[%c8, %c0_10], %74 {strides = array<i32>} : memref<32x128xf32, #tpu.memory_space<vmem>>, vector<8x128xf32>,
    %76 = vector.extract_strided_slice %3 {offsets = [8, 0], sizes = [1, 128], strides = [1, 1]} : vector<16x128xf32> to vector<1x128xf32>
    %77 = vector.shape_cast %76 : vector<1x128xf32> to vector<128xf32>
    %78 = vector.shape_cast %77 : vector<128xf32> to vector<1x128xf32>
    %79 = vector.broadcast %8 : vector<8x1xf32> to vector<8x128xf32>
    %80 = vector.broadcast %78 : vector<1x128xf32> to vector<8x128xf32>
    %81 = arith.mulf %79, %80 : vector<8x128xf32>
    %82 = arith.addf %5, %81 : vector<8x128xf32>
    %83 = vector.extract_strided_slice %3 {offsets = [9, 0], sizes = [1, 128], strides = [1, 1]} : vector<16x128xf32> to vector<1x128xf32>
    %84 = vector.shape_cast %83 : vector<1x128xf32> to vector<128xf32>
    %85 = vector.shape_cast %84 : vector<128xf32> to vector<1x128xf32>
    %86 = vector.broadcast %11 : vector<8x1xf32> to vector<8x128xf32>
    %87 = vector.broadcast %85 : vector<1x128xf32> to vector<8x128xf32>
    %88 = arith.mulf %86, %87 : vector<8x128xf32>
    %89 = arith.addf %82, %88 : vector<8x128xf32>
    %90 = vector.extract_strided_slice %3 {offsets = [10, 0], sizes = [1, 128], strides = [1, 1]} : vector<16x128xf32> to vector<1x128xf32>
    %91 = vector.shape_cast %90 : vector<1x128xf32> to vector<128xf32>
    %92 = vector.shape_cast %91 : vector<128xf32> to vector<1x128xf32>
    %93 = vector.broadcast %14 : vector<8x1xf32> to vector<8x128xf32>
    %94 = vector.broadcast %92 : vector<1x128xf32> to vector<8x128xf32>
    %95 = arith.mulf %93, %94 : vector<8x128xf32>
    %96 = arith.addf %89, %95 : vector<8x128xf32>
    %97 = vector.extract_strided_slice %3 {offsets = [11, 0], sizes = [1, 128], strides = [1, 1]} : vector<16x128xf32> to vector<1x128xf32>
    %98 = vector.shape_cast %97 : vector<1x128xf32> to vector<128xf32>
    %99 = vector.shape_cast %98 : vector<128xf32> to vector<1x128xf32>
    %100 = vector.broadcast %17 : vector<8x1xf32> to vector<8x128xf32>
    %101 = vector.broadcast %99 : vector<1x128xf32> to vector<8x128xf32>
    %102 = arith.mulf %100, %101 : vector<8x128xf32>
    %103 = arith.addf %96, %102 : vector<8x128xf32>
    %c16 = arith.constant 16 : index
    %c0_11 = arith.constant 0 : index
    %104 = vector.load %arg6[%c16, %c0_11] : memref<32x128xf32, #tpu.memory_space<vmem>>, vector<8x128xf32>
    tpu.vector_store %arg6[%c16, %c0_11], %103 {strides = array<i32>} : memref<32x128xf32, #tpu.memory_space<vmem>>, vector<8x128xf32>,
    %105 = vector.extract_strided_slice %3 {offsets = [12, 0], sizes = [1, 128], strides = [1, 1]} : vector<16x128xf32> to vector<1x128xf32>
    %106 = vector.shape_cast %105 : vector<1x128xf32> to vector<128xf32>
    %107 = vector.shape_cast %106 : vector<128xf32> to vector<1x128xf32>
    %108 = vector.broadcast %8 : vector<8x1xf32> to vector<8x128xf32>
    %109 = vector.broadcast %107 : vector<1x128xf32> to vector<8x128xf32>
    %110 = arith.mulf %108, %109 : vector<8x128xf32>
    %111 = arith.addf %5, %110 : vector<8x128xf32>
    %112 = vector.extract_strided_slice %3 {offsets = [13, 0], sizes = [1, 128], strides = [1, 1]} : vector<16x128xf32> to vector<1x128xf32>
    %113 = vector.shape_cast %112 : vector<1x128xf32> to vector<128xf32>
    %114 = vector.shape_cast %113 : vector<128xf32> to vector<1x128xf32>
    %115 = vector.broadcast %11 : vector<8x1xf32> to vector<8x128xf32>
    %116 = vector.broadcast %114 : vector<1x128xf32> to vector<8x128xf32>
    %117 = arith.mulf %115, %116 : vector<8x128xf32>
    %118 = arith.addf %111, %117 : vector<8x128xf32>
    %119 = vector.extract_strided_slice %3 {offsets = [14, 0], sizes = [1, 128], strides = [1, 1]} : vector<16x128xf32> to vector<1x128xf32>
    %120 = vector.shape_cast %119 : vector<1x128xf32> to vector<128xf32>
    %121 = vector.shape_cast %120 : vector<128xf32> to vector<1x128xf32>
    %122 = vector.broadcast %14 : vector<8x1xf32> to vector<8x128xf32>
    %123 = vector.broadcast %121 : vector<1x128xf32> to vector<8x128xf32>
    %124 = arith.mulf %122, %123 : vector<8x128xf32>
    %125 = arith.addf %118, %124 : vector<8x128xf32>
    %126 = vector.extract_strided_slice %3 {offsets = [15, 0], sizes = [1, 128], strides = [1, 1]} : vector<16x128xf32> to vector<1x128xf32>
    %127 = vector.shape_cast %126 : vector<1x128xf32> to vector<128xf32>
    %128 = vector.shape_cast %127 : vector<128xf32> to vector<1x128xf32>
    %129 = vector.broadcast %17 : vector<8x1xf32> to vector<8x128xf32>
    %130 = vector.broadcast %128 : vector<1x128xf32> to vector<8x128xf32>
    %131 = arith.mulf %129, %130 : vector<8x128xf32>
    %132 = arith.addf %125, %131 : vector<8x128xf32>
    %c24 = arith.constant 24 : index
    %c0_12 = arith.constant 0 : index
    %133 = vector.load %arg6[%c24, %c0_12] : memref<32x128xf32, #tpu.memory_space<vmem>>, vector<8x128xf32>
    tpu.vector_store %arg6[%c24, %c0_12], %132 {strides = array<i32>} : memref<32x128xf32, #tpu.memory_space<vmem>>, vector<8x128xf32>,
    return
  }
  func.func @transform_0(%arg0: i32, %arg1: i32) -> (i32, i32) {
    %c0_i32 = arith.constant 0 : i32
    return %arg0, %arg1 : i32, i32
  }
  func.func @transform_1(%arg0: i32, %arg1: i32) -> (i32, i32, i32) {
    %c0_i32 = arith.constant 0 : i32
    %c0_i32_0 = arith.constant 0 : i32
    %c0_i32_1 = arith.constant 0 : i32
    return %arg1, %c0_i32, %c0_i32_0 : i32, i32, i32
  }
  func.func @transform_2(%arg0: i32, %arg1: i32) -> (i32, i32) {
    %c0_i32 = arith.constant 0 : i32
    %c0_i32_0 = arith.constant 0 : i32
    %c0_i32_1 = arith.constant 0 : i32
    return %c0_i32, %c0_i32_0 : i32, i32
  }
  func.func @transform_3(%arg0: i32, %arg1: i32) -> (i32, i32) {
    %c0_i32 = arith.constant 0 : i32
    %c0_i32_0 = arith.constant 0 : i32
    return %c0_i32, %arg1 : i32, i32
  }
  func.func @transform_4(%arg0: i32, %arg1: i32) -> (i32, i32) {
    %c0_i32 = arith.constant 0 : i32
    return %arg0, %arg1 : i32, i32
  }
}

</mosaic_0001>

<bundles_post_ra>
// kernel: tpu_custom_call.1
= control target key start
LH: loop header
LB: loop body
LE: loop exit
PB: predicated region body
PF: predicated region fallthrough
CT: control target
= control target key end

     0   :  { %9 = vsyncpa [#allocation3], 0  ;;  %s1223_s0 = inlined_call_operand.hbm [shape: f32[32,128], index: 0, kind: input, shape index: {}]   ;;  %s1224_s1 = inlined_call_operand.hbm [shape: f32[1,128,128], index: 1, kind: input, shape index: {}]   ;;  %s1225_s2 = inlined_call_operand.vmem [shape: f32[8,4], index: 2, kind: input, shape index: {}]   ;;  %s1226_s3 = inlined_call_operand.vmem [shape: f32[8,128], index: 3, kind: input, shape index: {}]   ;;  %s1227_s4 = inlined_call_operand.hbm [shape: f32[64,128], index: 4, kind: output, shape index: {}]  }
   0x1   :  { %11 = vsyncpa [#allocation3 + $0x1], 0 }
   0x2   :  { %12 = vsyncpa [#allocation6], 0 }
   0x3   :  { %13 = vsyncpa [#allocation4], 0 }
   0x4   :  { %15 = vsyncpa [#allocation4 + $0x1], 0  ;;  %s987_s15 = smov 0   ;;  %s989_s16 = smov 0  }
   0x5   :  { %s991_s17 = smov 0   ;;  %s993_s18 = smov 0  }
   0x6   :  { %s995_s19 = smov 0   ;;  %s997_s20 = smov 0  }
   0x7 LB: > { %s614_s21 = sadd.s32 4294967295, %s949_s20   ;;  %s615_s22 = sadd.s32 4294967294, %s949_s20   ;;  %s949_s20 = sphi %s997_s20, %s21_s20   ;;  %s945_s19 = sphi %s995_s19, %s1251_s19   ;;  %s941_s18 = sphi %s993_s18, %s1250_s18   ;;  %s937_s17 = sphi %s991_s17, %s1249_s17   ;;  %s933_s16 = sphi %s989_s16, %s1248_s16   ;;  %s929_s15 = sphi %s987_s15, %s1247_s15  }
   0x8   : > { %p55_p0 = scmp.ne.s32.totalorder %s933_s16, %s929_s15  ;;  %p1021_p1 = scmp.eq.s32.totalorder %s614_s21, 0 }
   0x9   : > { %p1025_p2 = scmp.eq.s32.totalorder %s614_s21, 1  ;;  %p160_p3 = scmp.eq.s32.totalorder %s615_s22, 1 }
   0xa   : > { %s1232_s23 = scalar_select %p1021_p1, 1, 0 }
   0xb   : > { %s1233_s24 = scalar_select %p1025_p2, 1, 0 }
   0xc   : > { %p1031_p4 = por %p1021_p1, %p55_p0  ;;  %p616_p5 = scmp.ge.s32.totalorder %s949_s20, 1 }
   0xd   : > { %p1036_p6 = por %p160_p3, %p55_p0  ;;  %p167_p7 = scmp.lt.s32.totalorder %s949_s20, 3 }
   0xe   : > { %s1234_s25 = scalar_select %p1031_p4, 1, 0 }
   0xf   : > { %s1235_s26 = scalar_select %p1036_p6, 1, 0 }
  0x10   : > { %p1041_p8 = pnand %p616_p5, %p167_p7  ;;  %s951_s28 = smov [#allocation5]  }
  0x11   : > { %s182_s29 = sshll.u32 %s951_s28, 4  ;;  %s33_s5 = sadd.s32 1, %s945_s19  ;;  %s183_s29 = int_to_ptr.vmem [resolvable:$true] %s182_s29 }
  0x12   : > { %s1236_s27 = scalar_select %p1041_p8, 1, 0 }
  0x13   : > { %p727_p9 = pneg %p1041_p8  ;;  %s805_s8 = scalar_lea.hbm %s1224_s1, 2048 }
  0x14   : > { %p806_p12 = scmp.ne.s32.totalorder %s1224_s1, %s805_s8  ;;  %p812_p5 = scmp.lt.u32.totalorder %s805_s8, %s1224_s1 }
  0x15   : > { %p1050_p11 = pnand %p727_p9, %p1021_p1 }
  0x17   : > { %p807_p13 = pneg %p1050_p11 }
  0x19   : > { %p808_p0 = pnand %p807_p13, %p806_p12 }
  0x1b   : > { %p809_p3 = pneg %p808_p0 }
  0x1d   : > { %p814_p7 = pnand %p812_p5, %p809_p3 }
  0x1f   : > { %817 = shalt.err (!%p814_p7)
}
  0x20   : > { %s818_s13 = scalar_lea.vmem %s183_s29, 2048  ;;  %p826_p1 = scmp.lt.s32.totalorder %s183_s29, %s183_s29 }
  0x21   : > { %p819_p9 = scmp.ne.s32.totalorder %s183_s29, %s818_s13  ;;  %p827_p4 = scmp.lt.s32.totalorder %s818_s13, %s818_s13 }
  0x23   : > { %p821_p10 = pnand %p819_p9, %p807_p13  ;;  %p828_p8 = por %p827_p4, %p826_p1 }
  0x25   : > { %p822_p6 = pneg %p821_p10 }
  0x27   : > { %p829_p2 = pnand %p828_p8, %p822_p6 }
  0x29   : > { %832 = shalt.err (!%p829_p2)
}
  0x2a   : > { %s952_s14 = smov 128   ;;  %s953_s21 = smov 8  }
  0x2b   : > { %730 = dma.hbm_to_vmem [thread:$0]  (!%p1050_p11), %s1224_s1, 2048, %s183_s29, [#allocation6], %s952_s14, %s952_s14, %s953_s21  }
  0x2c   : > { %p35_p1 = scmp.ge.s32.totalorder %s33_s5, 2  ;;  %s42_s6 = sadd.s32 1, %s937_s17 }
  0x2d   : > { %p49_p2 = scmp.ne.s32.totalorder %s937_s17, %s933_s16  ;;  %p50_p4 = scmp.eq.s32.totalorder %s949_s20, 0 }
  0x2e   : > { %s1253_s5 = smov (%p35_p1, %s33_s5), 0  ;;  %p1239_p8 = scmp.ne.s32.totalorder %s1233_s24, 0 }
  0x2f   : > { %p1080_p6 = por %p50_p4, %p49_p2  ;;  %s37_s8 = ssub.s32 %s945_s19, %s1253_s5 }
  0x30   : > { %p1086_p10 = por %p1239_p8, %p49_p2  ;;  %p740_p12 = scmp.lt.s32.totalorder %s949_s20, 2 }
  0x31   : > { %p40_p11 = scmp.eq.s32.totalorder %s37_s8, 0  ;;  %s206_s29 = sand.u32 1, %s937_s17  }
  0x32   : > { %s620_s9 = sshll.u32 %s206_s29, 4  ;;  %s632_s11 = sshll.u32 %s945_s19, 8 }
  0x33   : > { %s1095_s10 = scalar_select %p40_p11, %s937_s17, %s42_s6  }
  0x34   : > { %s1101_s22 = scalar_lea.hbm %s1223_s0, %s632_s11  ;;  %s210_s24 = scalar_lea.vmem [#allocation2], %s620_s9 }
  0x35   : > { %s218_s28 = sshll.u32 %s210_s24, 4  ;;  %p1107_p13 = pnand %p740_p12, %p1080_p6  ;;  %s1103_s28 = int_to_ptr.vmem [resolvable:$true] %s218_s28 }
  0x36   : > { %s1111_s6 = scalar_lea.sflag [#allocation3], %s206_s29  ;;  %s833_s12 = scalar_lea.hbm %s1101_s22, 256 }
  0x37   : > { %p834_p0 = scmp.ne.s32.totalorder %s1101_s22, %s833_s12  ;;  %p835_p3 = pneg %p1107_p13 }
  0x38   : > { %s838_s7 = scalar_lea.hbm %s1223_s0, 512  ;;  %p839_p9 = scmp.lt.u32.totalorder %s1101_s22, %s1223_s0 }
  0x39   : > { %p836_p5 = pnand %p835_p3, %p834_p0  ;;  %p840_p1 = scmp.lt.u32.totalorder %s838_s7, %s833_s12 }
  0x3a   : > { %p842_p4 = scmp.lt.u32.totalorder %s833_s12, %s1101_s22 }
  0x3b   : > { %p837_p7 = pneg %p836_p5  ;;  %p841_p2 = por %p840_p1, %p839_p9 }
  0x3d   : > { %p843_p6 = por %p842_p4, %p841_p2 }
  0x3f   : > { %p844_p8 = pnand %p843_p6, %p837_p7 }
  0x41   : > { %847 = shalt.err (!%p844_p8)
}
  0x42   : > { %s848_s29 = scalar_lea.vmem %s1103_s28, 256  ;;  %s954_s9 = smov [#allocation2]  }
  0x43   : > { %p849_p12 = scmp.ne.s32.totalorder %s1103_s28, %s848_s29  ;;  %s853_s11 = sshll.u32 %s954_s9, 4  ;;  %s854_s11 = int_to_ptr.vmem [resolvable:$false] %s853_s11 }
  0x44   : > { %s855_s13 = scalar_lea.vmem %s854_s11, 512  ;;  %p856_p5 = scmp.lt.s32.totalorder %s1103_s28, %s854_s11 }
  0x45   : > { %p851_p11 = pnand %p849_p12, %p835_p3  ;;  %p857_p9 = scmp.lt.s32.totalorder %s855_s13, %s848_s29 }
  0x47   : > { %p852_p0 = pneg %p851_p11  ;;  %p858_p1 = por %p857_p9, %p856_p5 }
  0x49   : > { %p859_p2 = pnand %p858_p1, %p852_p0 }
  0x4b   : > { %862 = shalt.err (!%p859_p2)
}
  0x4c   : > { %734 = dma.hbm_to_vmem [thread:$0]  (!%p1107_p13), %s1101_s22, 256, %s1103_s28, %s1111_s6, %s952_s14, %s952_s14, %s953_s21  }
  0x4d   : > { %p1242_p3 = scmp.ne.s32.totalorder %s1236_s27, 0 }
  0x4e   : > { %s1145_s12 = sand.u32 (!%p1242_p3), 1, %s933_s16   ;;  %p1243_p7 = scmp.ne.s32.totalorder (!%p1242_p3), %s1234_s25, 0 }
  0x4f   : > { %230 = sbr.rel (%p1242_p3) target bundleno = 368 (0x170), region = 36  ;;  %s624_s7 = sshll.u32 (!%p1242_p3), %s1145_s12, 4 }
  0x50   : > { %s233_s24 = scalar_lea.sflag (!%p1242_p3), [#allocation3], %s1145_s12  ;;  %s1149_s29 = scalar_lea.vmem (!%p1242_p3), [#allocation2], %s624_s7 }
  0x56   : > { %916 = dma.done.wait (%p1243_p7), %s233_s24, 256  }
  0x57   : > { %918 = vsyncadd (%p1243_p7), %s233_s24, 4294967040  ;;  %p1244_p13 = scmp.ne.s32.totalorder %s1232_s23, 0 }
  0x59   : > { %920 = dma.done.wait (%p1244_p13), [#allocation6], 2048  }
  0x5a   : > { %922 = vsyncadd (%p1244_p13), [#allocation6], 4294965248  ;;  %v955_v0 = vmov 2   ;;  %v956_v1 = vmov 0   ;;  %v277_v2 = vld [vmem:[#allocation5] sm:$0xff]  ;;  %v278_v3 = vld [vmem:[#allocation5 + $0x8] sm:$0xff]  ;;  %v375_v31 = vlaneseq }
  0x5b   : > { %802 = vset.pattern.permute.xlu1 %v955_v0  ;;  %800 = vset.pattern.permute.xlu0 %v956_v1  ;;  %v279_v4 = vld [vmem:[#allocation5 + $0x10] sm:$0xff]  ;;  %v687_v5 = vpack.c.bf16 %v278_v3, %v277_v2  ;;  %v280_v6 = vld [vmem:[#allocation5 + $0x18] sm:$0xff]  ;;  %v281_v8 = vld [vmem:[#allocation5 + $0x20] sm:$0xff]  ;;  %v957_v18 = vmov 3   ;;  %v958_v19 = vmov 1   ;;  %s626_s21 = sshll.u32 %s1145_s12, 5 }
  0x5c   : > { %v691_v7 = vpack.c.bf16 %v280_v6, %v279_v4  ;;  %v282_v9 = vld [vmem:[#allocation5 + $0x28] sm:$0xff]  ;;  %v275_v11 = vld [vmem:[%s1149_s29] sm:$0xff]  ;;  %v284_v13 = vld [vmem:[#allocation5 + $0x38] sm:$0xff]  ;;  %v376_v32 = vshrl.u32 %v375_v31, 7  ;;  %s633_s22 = sshll.u32 %s941_s18, 9  ;;  %s268_s28 = scalar_lea.vmem [#allocation7], %s626_s21 }
  0x5d   : > { %688 = vmatprep.subr.bf16.mxu0 %v687_v5  ;;  %v695_v10 = vpack.c.bf16 %v282_v9, %v281_v8  ;;  %v283_v12 = vld [vmem:[#allocation5 + $0x30] sm:$0xff]  ;;  %684 = vmatprep.mubr.f32.mxu0 %v275_v11  ;;  %v368_v14 = vld [vmem:[%s1225_s2] sm:$0xff]  ;;  %v286_v17 = vld [vmem:[#allocation5 + $0x48] sm:$0xff]  ;;  %s502_s8 = sshll.u32 %s268_s28, 4  ;;  %s1172_s11 = scalar_lea.hbm %s1227_s4, %s633_s22  ;;  %s1174_s8 = int_to_ptr.vmem [resolvable:$true] %s502_s8 }
  0x5e   : > { %690 = vmatpush3.bf16.msra.mxu0 %v687_v5  ;;  %392 = vperm.xlu1 %802, %v368_v14   ;;  %v699_v15 = vpack.c.bf16 %v284_v13, %v283_v12  ;;  %v285_v16 = vld [vmem:[#allocation5 + $0x40] sm:$0xff]  ;;  %v287_v21 = vld [vmem:[#allocation5 + $0x50] sm:$0xff]  ;;  %v288_v22 = vld [vmem:[#allocation5 + $0x58] sm:$0xff]  ;;  %v377_v34 = vsub.s32 0, %v376_v32  ;;  %v387_v35 = vsub.s32 1, %v376_v32  ;;  %v407_v36 = vsub.s32 3, %v376_v32 }
  0x5f   : > { %692 = vmatprep.subr.bf16.mxu0 %v691_v7  ;;  %372 = vperm.xlu0 %800, %v368_v14   ;;  %v703_v20 = vpack.c.bf16 %v286_v17, %v285_v16  ;;  %v707_v23 = vpack.c.bf16 %v288_v22, %v287_v21  ;;  %v289_v24 = vld [vmem:[#allocation5 + $0x60] sm:$0xff]  ;;  %v290_v25 = vld [vmem:[#allocation5 + $0x68] sm:$0xff]  ;;  %v291_v27 = vld [vmem:[#allocation5 + $0x70] sm:$0xff]  ;;  %v397_v37 = vsub.s32 2, %v376_v32  ;;  %v414_v38 = vsub.s32 4, %v376_v32  ;;  %s488_s18 = scalar_lea.sflag [#allocation4], %s1145_s12 }
  0x60   : > { %v711_v26 = vpack.c.bf16 %v290_v25, %v289_v24  ;;  %v292_v28 = vld [vmem:[#allocation5 + $0x78] sm:$0xff]  ;;  %v432_v40 = vsub.s32 7, %v376_v32  ;;  %v420_v43 = vsub.s32 5, %v376_v32  ;;  %v426_v44 = vsub.s32 6, %v376_v32  ;;  %v369_v49 = vld [vmem:[%s1226_s3] sm:$0xff]  ;;  %s863_s13 = scalar_lea.vmem %s1174_s8, 512 }
  0x61   : > { %v715_v29 = vpack.c.bf16 %v292_v28, %v291_v27  ;;  %v276_v30 = vld [vmem:[%s1149_s29 + $0x8] sm:$0xff]  ;;  %p864_p4 = scmp.ne.s32.totalorder %s1174_s8, %s863_s13  ;;  %s959_s7 = smov [#allocation7]  }
  0x62   : > { %694 = vmatpush3.bf16.msra.mxu0 %v691_v7  ;;  %803 = vset.pattern.permute.xlu1 %v957_v18  ;;  %s867_s24 = sshll.u32 %s959_s7, 4  ;;  %s868_s24 = int_to_ptr.vmem [resolvable:$false] %s867_s24 }
  0x63   : > { %696 = vmatprep.subr.bf16.mxu0 %v695_v10  ;;  %801 = vset.pattern.permute.xlu0 %v958_v19  ;;  %p865_p6 = pnand %p864_p4, %p1086_p10  ;;  %s869_s29 = scalar_lea.vmem %s868_s24, 1024 }
  0x64   : > { %402 = vperm.xlu1 %803, %v368_v14   ;;  %382 = vperm.xlu0 %801, %v368_v14   ;;  %p870_p12 = scmp.lt.s32.totalorder %s1174_s8, %s868_s24  ;;  %p871_p11 = scmp.lt.s32.totalorder %s869_s29, %s863_s13 }
  0x65   : > { %p866_p8 = pneg %p865_p6 }
  0x66   : > { %698 = vmatpush3.bf16.msra.mxu0 %v695_v10  ;;  %p872_p0 = por %p871_p11, %p870_p12 }
  0x67   : > { %700 = vmatprep.subr.bf16.mxu0 %v699_v15 }
  0x68   : > { %804 = vset.pattern.permute.xlu0 %v957_v18  ;;  %p873_p5 = pnand %p872_p0, %p866_p8 }
  0x6a   : > { %702 = vmatpush3.bf16.msra.mxu0 %v699_v15 }
  0x6b   : > { %704 = vmatprep.subr.bf16.mxu0 %v703_v20 }
  0x6e   : > { %706 = vmatpush3.bf16.msra.mxu0 %v703_v20 }
  0x6f   : > { %708 = vmatprep.subr.bf16.mxu0 %v707_v23 }
  0x72   : > { %710 = vmatpush3.bf16.msra.mxu0 %v707_v23 }
  0x73   : > { %712 = vmatprep.subr.bf16.mxu0 %v711_v26 }
  0x76   : > { %714 = vmatpush3.bf16.msra.mxu0 %v711_v26 }
  0x77   : > { %716 = vmatprep.subr.bf16.mxu0 %v715_v29 }
  0x7a   : > { %718 = vmatpush3.bf16.msra.mxu0 %v715_v29 }
  0x7d   : > { %685 = vmatmul.mubr.f32.vlgmr.msra.gmra.mrb[0].mxu0 %v276_v30 }
  0xdd   : > { %v393_v41 = vpop.permute.xlu1 %392 }
  0xde   : > { %v373_v33 = vpop.permute.xlu0 %372 }
  0xe3   : > { %v383_v50 = vpop.permute.xlu0 %382  ;;  %v403_v1 = vpop.permute.xlu1 %402 }
 0x150   : > { %v686_v39 = vpop.f32.mrb[0].mxu0 }
 0x151   : > { %v359_v42 = vpop.f32.mrb[1].mxu0  ;;  %v440_v47 = vrot.slane %v686_v39, %v377_v34  ;;  %v458_v48 = vrot.slane %v686_v39, %v407_v36  ;;  %v483_v54 = vrot.slane %v686_v39, %v432_v40  ;;  %v446_v56 = vrot.slane %v686_v39, %v387_v35 }
 0x152   : > { %v378_v45 = vrot.slane %v359_v42, %v377_v34  ;;  %v388_v46 = vrot.slane %v359_v42, %v387_v35  ;;  %v398_v51 = vrot.slane %v359_v42, %v397_v37  ;;  %v415_v52 = vrot.slane %v359_v42, %v414_v38 }
 0x153   : > { %v408_v53 = vrot.slane %v359_v42, %v407_v36  ;;  %v433_v57 = vrot.slane %v359_v42, %v432_v40  ;;  %v421_v59 = vrot.slane %v359_v42, %v420_v43  ;;  %v427_v60 = vrot.slane %v359_v42, %v426_v44 }
 0x154   : > { %v379_v55 = vmul.f32 %v378_v45, %v373_v33  ;;  %v416_v58 = vmul.f32 %v415_v52, %v373_v33  ;;  %v389_v62 = vmul.f32 %v388_v46, %v383_v50  ;;  %v441_v63 = vmul.f32 %v440_v47, %v373_v33 }
 0x155   : > { %v452_v0 = vrot.slane %v686_v39, %v397_v37  ;;  %v399_v2 = vmul.f32 %v398_v51, %v393_v41  ;;  %v422_v4 = vmul.f32 %v421_v59, %v383_v50  ;;  %v465_v5 = vrot.slane %v686_v39, %v414_v38 }
 0x156   : > { %v380_v61 = vadd.f32 %v379_v55, %v369_v49  ;;  %v417_v3 = vadd.f32 %v416_v58, %v369_v49  ;;  %v442_v7 = vadd.f32 %v441_v63, %v369_v49  ;;  %v447_v8 = vmul.f32 %v446_v56, %v383_v50 }
 0x157   : > { %v471_v9 = vrot.slane %v686_v39, %v420_v43  ;;  %v428_v11 = vmul.f32 %v427_v60, %v393_v41  ;;  %v466_v12 = vmul.f32 %v465_v5, %v373_v33  ;;  %v477_v13 = vrot.slane %v686_v39, %v426_v44 }
 0x158   : > { %v390_v6 = vadd.f32 %v389_v62, %v380_v61  ;;  %v423_v10 = vadd.f32 %v422_v4, %v417_v3  ;;  %v409_v14 = vmul.f32 %v408_v53, %v403_v1  ;;  %v448_v16 = vadd.f32 %v447_v8, %v442_v7 }
 0x159   : > { %v453_v17 = vmul.f32 %v452_v0, %v393_v41  ;;  %v434_v18 = vmul.f32 %v433_v57, %v403_v1  ;;  %v467_v20 = vadd.f32 %v466_v12, %v369_v49  ;;  %v472_v21 = vmul.f32 %v471_v9, %v383_v50 }
 0x15a   : > { %v400_v15 = vadd.f32 %v399_v2, %v390_v6  ;;  %v429_v19 = vadd.f32 %v428_v11, %v423_v10  ;;  %v459_v22 = vmul.f32 %v458_v48, %v403_v1  ;;  %v478_v27 = vmul.f32 %v477_v13, %v393_v41 }
 0x15b   : > { %v454_v24 = vadd.f32 %v453_v17, %v448_v16  ;;  %v473_v26 = vadd.f32 %v472_v21, %v467_v20  ;;  %v484_v29 = vmul.f32 %v483_v54, %v403_v1 }
 0x15c   : > { %v410_v23 = vadd.f32 %v409_v14, %v400_v15  ;;  %v435_v25 = vadd.f32 %v434_v18, %v429_v19 }
 0x15d   : > { %v460_v28 = vadd.f32 %v459_v22, %v454_v24  ;;  %v479_v30 = vadd.f32 %v478_v27, %v473_v26 }
 0x15e   : > { %411 = vst [vmem:[%s268_s28] sm:$0xff] %v410_v23  ;;  %436 = vst [vmem:[%s268_s28 + $0x8] sm:$0xff] %v435_v25 }
 0x15f   : > { %461 = vst [vmem:[%s268_s28 + $0x10] sm:$0xff] %v460_v28  ;;  %v485_v31 = vadd.f32 %v484_v29, %v479_v30 }
 0x161   : > { %486 = vst [vmem:[%s268_s28 + $0x18] sm:$0xff] %v485_v31 }
 0x162   : > { %876 = shalt.err (!%p873_p5)
}
 0x163   : > { %s877_s23 = scalar_lea.hbm %s1172_s11, 512  ;;  %s881_s14 = scalar_lea.hbm %s1227_s4, 1024 }
 0x164   : > { %p878_p9 = scmp.ne.s32.totalorder %s1172_s11, %s877_s23  ;;  %p882_p3 = scmp.lt.u32.totalorder %s1172_s11, %s1227_s4 }
 0x165   : > { %p883_p7 = scmp.lt.u32.totalorder %s881_s14, %s877_s23  ;;  %p885_p4 = scmp.lt.u32.totalorder %s877_s23, %s1172_s11 }
 0x166   : > { %p879_p1 = pnand %p878_p9, %p1086_p10 }
 0x167   : > { %p884_p13 = por %p883_p7, %p882_p3 }
 0x168   : > { %p880_p2 = pneg %p879_p1 }
 0x169   : > { %p886_p6 = por %p885_p4, %p884_p13 }
 0x16b   : > { %p887_p8 = pnand %p886_p6, %p880_p2 }
 0x16d   : > { %890 = shalt.err (!%p887_p8)
}
 0x16e   : > { %s960_s28 = smov 128   ;;  %s961_s6 = smov 8  }
 0x16f   : > { %725 = dma.vmem_to_hbm [thread:$0]  (%p1086_p10), %s1174_s8, 512, %s1172_s11, %s488_s18, %s960_s28, %s960_s28, %s961_s6  }
 0x170 PF: > { %s517_s9 = sand.u32 1, %s929_s15   ;;  %p1245_p12 = scmp.ne.s32.totalorder %s1235_s26, 0 }
 0x171   : > { %p1246_p11 = scmp.ge.s32.totalorder %s949_s20, 2  ;;  %s518_s13 = scalar_lea.sflag [#allocation4], %s517_s9 }
 0x173   : > { %p736_p0 = pnand %p1246_p11, %p1245_p12 }
 0x175   : > { %924 = dma.done.wait (!%p736_p0), %s518_s13, 512  }
 0x176   : > { %926 = vsyncadd (!%p736_p0), %s518_s13, 4294966784  ;;  %s21_s20 = sadd.s32 1, %s949_s20   ;;  %s1247_s15 = smov %s933_s16 }
 0x177   : > { %p18_p5 = scmp.ge.s32.totalorder %s21_s20, 4   ;;  %s1248_s16 = smov %s937_s17 }
 0x178   : > { %s1249_s17 = smov %s1095_s10  ;;  %s1250_s18 = smov %s945_s19 }
 0x179   : > { %s1251_s19 = smov %s1253_s5  ;;  %20 = sbr.rel (!%p18_p5) target bundleno = 7 (0x7), region = 89 }
 0x180   :  { %523 = vsyncpa [#allocation3], 1 }
 0x181   :  { %525 = vsyncpa [#allocation3 + $0x1], 1 }
 0x182   :  { %526 = vsyncpa [#allocation6], 1 }
 0x183   :  { %527 = vsyncpa [#allocation4], 1 }
 0x184   :  { %529 = vsyncpa [#allocation4 + $0x1], 1 }

// kernel: tpu_custom_call.1
= control target key start
LH: loop header
LB: loop body
LE: loop exit
PB: predicated region body
PF: predicated region fallthrough
CT: control target
= control target key end

     0   :  { %9 = vsyncpa [#allocation3], 0  ;;  %s1223_s0 = inlined_call_operand.hbm [shape: f32[32,128], index: 0, kind: input, shape index: {}]   ;;  %s1224_s1 = inlined_call_operand.hbm [shape: f32[1,128,128], index: 1, kind: input, shape index: {}]   ;;  %s1225_s2 = inlined_call_operand.vmem [shape: f32[8,4], index: 2, kind: input, shape index: {}]   ;;  %s1226_s3 = inlined_call_operand.vmem [shape: f32[8,128], index: 3, kind: input, shape index: {}]   ;;  %s1227_s4 = inlined_call_operand.hbm [shape: f32[64,128], index: 4, kind: output, shape index: {}]  }
   0x1   :  { %11 = vsyncpa [#allocation3 + $0x1], 0 }
   0x2   :  { %12 = vsyncpa [#allocation6], 0 }
   0x3   :  { %13 = vsyncpa [#allocation4], 0 }
   0x4   :  { %15 = vsyncpa [#allocation4 + $0x1], 0  ;;  %s987_s15 = smov 0   ;;  %s989_s16 = smov 0  }
   0x5   :  { %s991_s17 = smov 0   ;;  %s993_s18 = smov 0  }
   0x6   :  { %s995_s19 = smov 0   ;;  %s997_s20 = smov 0  }
   0x7 LB: > { %s614_s21 = sadd.s32 4294967295, %s949_s20   ;;  %s615_s22 = sadd.s32 4294967294, %s949_s20   ;;  %s949_s20 = sphi %s997_s20, %s21_s20   ;;  %s945_s19 = sphi %s995_s19, %s1251_s19   ;;  %s941_s18 = sphi %s993_s18, %s1250_s18   ;;  %s937_s17 = sphi %s991_s17, %s1249_s17   ;;  %s933_s16 = sphi %s989_s16, %s1248_s16   ;;  %s929_s15 = sphi %s987_s15, %s1247_s15  }
   0x8   : > { %p55_p0 = scmp.ne.s32.totalorder %s933_s16, %s929_s15  ;;  %p1021_p1 = scmp.eq.s32.totalorder %s614_s21, 0 }
   0x9   : > { %p1025_p2 = scmp.eq.s32.totalorder %s614_s21, 1  ;;  %p160_p3 = scmp.eq.s32.totalorder %s615_s22, 1 }
   0xa   : > { %s1232_s23 = scalar_select %p1021_p1, 1, 0 }
   0xb   : > { %s1233_s24 = scalar_select %p1025_p2, 1, 0 }
   0xc   : > { %p1031_p4 = por %p1021_p1, %p55_p0  ;;  %p616_p5 = scmp.ge.s32.totalorder %s949_s20, 1 }
   0xd   : > { %p1036_p6 = por %p160_p3, %p55_p0  ;;  %p167_p7 = scmp.lt.s32.totalorder %s949_s20, 3 }
   0xe   : > { %s1234_s25 = scalar_select %p1031_p4, 1, 0 }
   0xf   : > { %s1235_s26 = scalar_select %p1036_p6, 1, 0 }
  0x10   : > { %p1041_p8 = pnand %p616_p5, %p167_p7  ;;  %s951_s28 = smov [#allocation5]  }
  0x11   : > { %s182_s29 = sshll.u32 %s951_s28, 4  ;;  %s33_s5 = sadd.s32 1, %s945_s19  ;;  %s183_s29 = int_to_ptr.vmem [resolvable:$true] %s182_s29 }
  0x12   : > { %s1236_s27 = scalar_select %p1041_p8, 1, 0 }
  0x13   : > { %p727_p9 = pneg %p1041_p8  ;;  %s805_s8 = scalar_lea.hbm %s1224_s1, 2048 }
  0x14   : > { %p806_p12 = scmp.ne.s32.totalorder %s1224_s1, %s805_s8  ;;  %p812_p5 = scmp.lt.u32.totalorder %s805_s8, %s1224_s1 }
  0x15   : > { %p1050_p11 = pnand %p727_p9, %p1021_p1 }
  0x17   : > { %p807_p13 = pneg %p1050_p11 }
  0x19   : > { %p808_p0 = pnand %p807_p13, %p806_p12 }
  0x1b   : > { %p809_p3 = pneg %p808_p0 }
  0x1d   : > { %p814_p7 = pnand %p812_p5, %p809_p3 }
  0x1f   : > { %817 = shalt.err (!%p814_p7)
}
  0x20   : > { %s818_s13 = scalar_lea.vmem %s183_s29, 2048  ;;  %p826_p1 = scmp.lt.s32.totalorder %s183_s29, %s183_s29 }
  0x21   : > { %p819_p9 = scmp.ne.s32.totalorder %s183_s29, %s818_s13  ;;  %p827_p4 = scmp.lt.s32.totalorder %s818_s13, %s818_s13 }
  0x23   : > { %p821_p10 = pnand %p819_p9, %p807_p13  ;;  %p828_p8 = por %p827_p4, %p826_p1 }
  0x25   : > { %p822_p6 = pneg %p821_p10 }
  0x27   : > { %p829_p2 = pnand %p828_p8, %p822_p6 }
  0x29   : > { %832 = shalt.err (!%p829_p2)
}
  0x2a   : > { %s952_s14 = smov 128   ;;  %s953_s21 = smov 8  }
  0x2b   : > { %730 = dma.hbm_to_vmem [thread:$0]  (!%p1050_p11), %s1224_s1, 2048, %s183_s29, [#allocation6], %s952_s14, %s952_s14, %s953_s21  }
  0x2c   : > { %p35_p1 = scmp.ge.s32.totalorder %s33_s5, 2  ;;  %s42_s6 = sadd.s32 1, %s937_s17 }
  0x2d   : > { %p49_p2 = scmp.ne.s32.totalorder %s937_s17, %s933_s16  ;;  %p50_p4 = scmp.eq.s32.totalorder %s949_s20, 0 }
  0x2e   : > { %s1253_s5 = smov (%p35_p1, %s33_s5), 0  ;;  %p1239_p8 = scmp.ne.s32.totalorder %s1233_s24, 0 }
  0x2f   : > { %p1080_p6 = por %p50_p4, %p49_p2  ;;  %s37_s8 = ssub.s32 %s945_s19, %s1253_s5 }
  0x30   : > { %p1086_p10 = por %p1239_p8, %p49_p2  ;;  %p740_p12 = scmp.lt.s32.totalorder %s949_s20, 2 }
  0x31   : > { %p40_p11 = scmp.eq.s32.totalorder %s37_s8, 0  ;;  %s206_s29 = sand.u32 1, %s937_s17  }
  0x32   : > { %s620_s9 = sshll.u32 %s206_s29, 4  ;;  %s632_s11 = sshll.u32 %s945_s19, 8 }
  0x33   : > { %s1095_s10 = scalar_select %p40_p11, %s937_s17, %s42_s6  }
  0x34   : > { %s1101_s22 = scalar_lea.hbm %s1223_s0, %s632_s11  ;;  %s210_s24 = scalar_lea.vmem [#allocation2], %s620_s9 }
  0x35   : > { %s218_s28 = sshll.u32 %s210_s24, 4  ;;  %p1107_p13 = pnand %p740_p12, %p1080_p6  ;;  %s1103_s28 = int_to_ptr.vmem [resolvable:$true] %s218_s28 }
  0x36   : > { %s1111_s6 = scalar_lea.sflag [#allocation3], %s206_s29  ;;  %s833_s12 = scalar_lea.hbm %s1101_s22, 256 }
  0x37   : > { %p834_p0 = scmp.ne.s32.totalorder %s1101_s22, %s833_s12  ;;  %p835_p3 = pneg %p1107_p13 }
  0x38   : > { %s838_s7 = scalar_lea.hbm %s1223_s0, 512  ;;  %p839_p9 = scmp.lt.u32.totalorder %s1101_s22, %s1223_s0 }
  0x39   : > { %p836_p5 = pnand %p835_p3, %p834_p0  ;;  %p840_p1 = scmp.lt.u32.totalorder %s838_s7, %s833_s12 }
  0x3a   : > { %p842_p4 = scmp.lt.u32.totalorder %s833_s12, %s1101_s22 }
  0x3b   : > { %p837_p7 = pneg %p836_p5  ;;  %p841_p2 = por %p840_p1, %p839_p9 }
  0x3d   : > { %p843_p6 = por %p842_p4, %p841_p2 }
  0x3f   : > { %p844_p8 = pnand %p843_p6, %p837_p7 }
  0x41   : > { %847 = shalt.err (!%p844_p8)
}
  0x42   : > { %s848_s29 = scalar_lea.vmem %s1103_s28, 256  ;;  %s954_s9 = smov [#allocation2]  }
  0x43   : > { %p849_p12 = scmp.ne.s32.totalorder %s1103_s28, %s848_s29  ;;  %s853_s11 = sshll.u32 %s954_s9, 4  ;;  %s854_s11 = int_to_ptr.vmem [resolvable:$false] %s853_s11 }
  0x44   : > { %s855_s13 = scalar_lea.vmem %s854_s11, 512  ;;  %p856_p5 = scmp.lt.s32.totalorder %s1103_s28, %s854_s11 }
  0x45   : > { %p851_p11 = pnand %p849_p12, %p835_p3  ;;  %p857_p9 = scmp.lt.s32.totalorder %s855_s13, %s848_s29 }
  0x47   : > { %p852_p0 = pneg %p851_p11  ;;  %p858_p1 = por %p857_p9, %p856_p5 }
  0x49   : > { %p859_p2 = pnand %p858_p1, %p852_p0 }
  0x4b   : > { %862 = shalt.err (!%p859_p2)
}
  0x4c   : > { %734 = dma.hbm_to_vmem [thread:$0]  (!%p1107_p13), %s1101_s22, 256, %s1103_s28, %s1111_s6, %s952_s14, %s952_s14, %s953_s21  }
  0x4d   : > { %p1242_p3 = scmp.ne.s32.totalorder %s1236_s27, 0 }
  0x4e   : > { %s1145_s12 = sand.u32 (!%p1242_p3), 1, %s933_s16   ;;  %p1243_p7 = scmp.ne.s32.totalorder (!%p1242_p3), %s1234_s25, 0 }
  0x4f   : > { %230 = sbr.rel (%p1242_p3) target bundleno = 368 (0x170), region = 36  ;;  %s624_s7 = sshll.u32 (!%p1242_p3), %s1145_s12, 4 }
  0x50   : > { %s233_s24 = scalar_lea.sflag (!%p1242_p3), [#allocation3], %s1145_s12  ;;  %s1149_s29 = scalar_lea.vmem (!%p1242_p3), [#allocation2], %s624_s7 }
  0x56   : > { %916 = dma.done.wait (%p1243_p7), %s233_s24, 256  }
  0x57   : > { %918 = vsyncadd (%p1243_p7), %s233_s24, 4294967040  ;;  %p1244_p13 = scmp.ne.s32.totalorder %s1232_s23, 0 }
  0x59   : > { %920 = dma.done.wait (%p1244_p13), [#allocation6], 2048  }
  0x5a   : > { %922 = vsyncadd (%p1244_p13), [#allocation6], 4294965248  ;;  %v955_v0 = vmov 2   ;;  %v956_v1 = vmov 0   ;;  %v277_v2 = vld [vmem:[#allocation5] sm:$0xff]  ;;  %v278_v3 = vld [vmem:[#allocation5 + $0x8] sm:$0xff]  ;;  %v375_v31 = vlaneseq }
  0x5b   : > { %802 = vset.pattern.permute.xlu1 %v955_v0  ;;  %800 = vset.pattern.permute.xlu0 %v956_v1  ;;  %v279_v4 = vld [vmem:[#allocation5 + $0x10] sm:$0xff]  ;;  %v687_v5 = vpack.c.bf16 %v278_v3, %v277_v2  ;;  %v280_v6 = vld [vmem:[#allocation5 + $0x18] sm:$0xff]  ;;  %v281_v8 = vld [vmem:[#allocation5 + $0x20] sm:$0xff]  ;;  %v957_v18 = vmov 3   ;;  %v958_v19 = vmov 1   ;;  %s626_s21 = sshll.u32 %s1145_s12, 5 }
  0x5c   : > { %v691_v7 = vpack.c.bf16 %v280_v6, %v279_v4  ;;  %v282_v9 = vld [vmem:[#allocation5 + $0x28] sm:$0xff]  ;;  %v275_v11 = vld [vmem:[%s1149_s29] sm:$0xff]  ;;  %v284_v13 = vld [vmem:[#allocation5 + $0x38] sm:$0xff]  ;;  %v376_v32 = vshrl.u32 %v375_v31, 7  ;;  %s633_s22 = sshll.u32 %s941_s18, 9  ;;  %s268_s28 = scalar_lea.vmem [#allocation7], %s626_s21 }
  0x5d   : > { %688 = vmatprep.subr.bf16.mxu0 %v687_v5  ;;  %v695_v10 = vpack.c.bf16 %v282_v9, %v281_v8  ;;  %v283_v12 = vld [vmem:[#allocation5 + $0x30] sm:$0xff]  ;;  %684 = vmatprep.mubr.f32.mxu0 %v275_v11  ;;  %v368_v14 = vld [vmem:[%s1225_s2] sm:$0xff]  ;;  %v286_v17 = vld [vmem:[#allocation5 + $0x48] sm:$0xff]  ;;  %s502_s8 = sshll.u32 %s268_s28, 4  ;;  %s1172_s11 = scalar_lea.hbm %s1227_s4, %s633_s22  ;;  %s1174_s8 = int_to_ptr.vmem [resolvable:$true] %s502_s8 }
  0x5e   : > { %690 = vmatpush3.bf16.msra.mxu0 %v687_v5  ;;  %392 = vperm.xlu1 %802, %v368_v14   ;;  %v699_v15 = vpack.c.bf16 %v284_v13, %v283_v12  ;;  %v285_v16 = vld [vmem:[#allocation5 + $0x40] sm:$0xff]  ;;  %v287_v21 = vld [vmem:[#allocation5 + $0x50] sm:$0xff]  ;;  %v288_v22 = vld [vmem:[#allocation5 + $0x58] sm:$0xff]  ;;  %v377_v34 = vsub.s32 0, %v376_v32  ;;  %v387_v35 = vsub.s32 1, %v376_v32  ;;  %v407_v36 = vsub.s32 3, %v376_v32 }
  0x5f   : > { %692 = vmatprep.subr.bf16.mxu0 %v691_v7  ;;  %372 = vperm.xlu0 %800, %v368_v14   ;;  %v703_v20 = vpack.c.bf16 %v286_v17, %v285_v16  ;;  %v707_v23 = vpack.c.bf16 %v288_v22, %v287_v21  ;;  %v289_v24 = vld [vmem:[#allocation5 + $0x60] sm:$0xff]  ;;  %v290_v25 = vld [vmem:[#allocation5 + $0x68] sm:$0xff]  ;;  %v291_v27 = vld [vmem:[#allocation5 + $0x70] sm:$0xff]  ;;  %v397_v37 = vsub.s32 2, %v376_v32  ;;  %v414_v38 = vsub.s32 4, %v376_v32  ;;  %s488_s18 = scalar_lea.sflag [#allocation4], %s1145_s12 }
  0x60   : > { %v711_v26 = vpack.c.bf16 %v290_v25, %v289_v24  ;;  %v292_v28 = vld [vmem:[#allocation5 + $0x78] sm:$0xff]  ;;  %v432_v40 = vsub.s32 7, %v376_v32  ;;  %v420_v43 = vsub.s32 5, %v376_v32  ;;  %v426_v44 = vsub.s32 6, %v376_v32  ;;  %v369_v49 = vld [vmem:[%s1226_s3] sm:$0xff]  ;;  %s863_s13 = scalar_lea.vmem %s1174_s8, 512 }
  0x61   : > { %v715_v29 = vpack.c.bf16 %v292_v28, %v291_v27  ;;  %v276_v30 = vld [vmem:[%s1149_s29 + $0x8] sm:$0xff]  ;;  %p864_p4 = scmp.ne.s32.totalorder %s1174_s8, %s863_s13  ;;  %s959_s7 = smov [#allocation7]  }
  0x62   : > { %694 = vmatpush3.bf16.msra.mxu0 %v691_v7  ;;  %803 = vset.pattern.permute.xlu1 %v957_v18  ;;  %s867_s24 = sshll.u32 %s959_s7, 4  ;;  %s868_s24 = int_to_ptr.vmem [resolvable:$false] %s867_s24 }
  0x63   : > { %696 = vmatprep.subr.bf16.mxu0 %v695_v10  ;;  %801 = vset.pattern.permute.xlu0 %v958_v19  ;;  %p865_p6 = pnand %p864_p4, %p1086_p10  ;;  %s869_s29 = scalar_lea.vmem %s868_s24, 1024 }
  0x64   : > { %402 = vperm.xlu1 %803, %v368_v14   ;;  %382 = vperm.xlu0 %801, %v368_v14   ;;  %p870_p12 = scmp.lt.s32.totalorder %s1174_s8, %s868_s24  ;;  %p871_p11 = scmp.lt.s32.totalorder %s869_s29, %s863_s13 }
  0x65   : > { %p866_p8 = pneg %p865_p6 }
  0x66   : > { %698 = vmatpush3.bf16.msra.mxu0 %v695_v10  ;;  %p872_p0 = por %p871_p11, %p870_p12 }
  0x67   : > { %700 = vmatprep.subr.bf16.mxu0 %v699_v15 }
  0x68   : > { %804 = vset.pattern.permute.xlu0 %v957_v18  ;;  %p873_p5 = pnand %p872_p0, %p866_p8 }
  0x6a   : > { %702 = vmatpush3.bf16.msra.mxu0 %v699_v15 }
  0x6b   : > { %704 = vmatprep.subr.bf16.mxu0 %v703_v20 }
  0x6e   : > { %706 = vmatpush3.bf16.msra.mxu0 %v703_v20 }
  0x6f   : > { %708 = vmatprep.subr.bf16.mxu0 %v707_v23 }
  0x72   : > { %710 = vmatpush3.bf16.msra.mxu0 %v707_v23 }
  0x73   : > { %712 = vmatprep.subr.bf16.mxu0 %v711_v26 }
  0x76   : > { %714 = vmatpush3.bf16.msra.mxu0 %v711_v26 }
  0x77   : > { %716 = vmatprep.subr.bf16.mxu0 %v715_v29 }
  0x7a   : > { %718 = vmatpush3.bf16.msra.mxu0 %v715_v29 }
  0x7d   : > { %685 = vmatmul.mubr.f32.vlgmr.msra.gmra.mrb[0].mxu0 %v276_v30 }
  0xdd   : > { %v393_v41 = vpop.permute.xlu1 %392 }
  0xde   : > { %v373_v33 = vpop.permute.xlu0 %372 }
  0xe3   : > { %v383_v50 = vpop.permute.xlu0 %382  ;;  %v403_v1 = vpop.permute.xlu1 %402 }
 0x150   : > { %v686_v39 = vpop.f32.mrb[0].mxu0 }
 0x151   : > { %v359_v42 = vpop.f32.mrb[1].mxu0  ;;  %v440_v47 = vrot.slane %v686_v39, %v377_v34  ;;  %v458_v48 = vrot.slane %v686_v39, %v407_v36  ;;  %v483_v54 = vrot.slane %v686_v39, %v432_v40  ;;  %v446_v56 = vrot.slane %v686_v39, %v387_v35 }
 0x152   : > { %v378_v45 = vrot.slane %v359_v42, %v377_v34  ;;  %v388_v46 = vrot.slane %v359_v42, %v387_v35  ;;  %v398_v51 = vrot.slane %v359_v42, %v397_v37  ;;  %v415_v52 = vrot.slane %v359_v42, %v414_v38 }
 0x153   : > { %v408_v53 = vrot.slane %v359_v42, %v407_v36  ;;  %v433_v57 = vrot.slane %v359_v42, %v432_v40  ;;  %v421_v59 = vrot.slane %v359_v42, %v420_v43  ;;  %v427_v60 = vrot.slane %v359_v42, %v426_v44 }
 0x154   : > { %v379_v55 = vmul.f32 %v378_v45, %v373_v33  ;;  %v416_v58 = vmul.f32 %v415_v52, %v373_v33  ;;  %v389_v62 = vmul.f32 %v388_v46, %v383_v50  ;;  %v441_v63 = vmul.f32 %v440_v47, %v373_v33 }
 0x155   : > { %v452_v0 = vrot.slane %v686_v39, %v397_v37  ;;  %v399_v2 = vmul.f32 %v398_v51, %v393_v41  ;;  %v422_v4 = vmul.f32 %v421_v59, %v383_v50  ;;  %v465_v5 = vrot.slane %v686_v39, %v414_v38 }
 0x156   : > { %v380_v61 = vadd.f32 %v379_v55, %v369_v49  ;;  %v417_v3 = vadd.f32 %v416_v58, %v369_v49  ;;  %v442_v7 = vadd.f32 %v441_v63, %v369_v49  ;;  %v447_v8 = vmul.f32 %v446_v56, %v383_v50 }
 0x157   : > { %v471_v9 = vrot.slane %v686_v39, %v420_v43  ;;  %v428_v11 = vmul.f32 %v427_v60, %v393_v41  ;;  %v466_v12 = vmul.f32 %v465_v5, %v373_v33  ;;  %v477_v13 = vrot.slane %v686_v39, %v426_v44 }
 0x158   : > { %v390_v6 = vadd.f32 %v389_v62, %v380_v61  ;;  %v423_v10 = vadd.f32 %v422_v4, %v417_v3  ;;  %v409_v14 = vmul.f32 %v408_v53, %v403_v1  ;;  %v448_v16 = vadd.f32 %v447_v8, %v442_v7 }
 0x159   : > { %v453_v17 = vmul.f32 %v452_v0, %v393_v41  ;;  %v434_v18 = vmul.f32 %v433_v57, %v403_v1  ;;  %v467_v20 = vadd.f32 %v466_v12, %v369_v49  ;;  %v472_v21 = vmul.f32 %v471_v9, %v383_v50 }
 0x15a   : > { %v400_v15 = vadd.f32 %v399_v2, %v390_v6  ;;  %v429_v19 = vadd.f32 %v428_v11, %v423_v10  ;;  %v459_v22 = vmul.f32 %v458_v48, %v403_v1  ;;  %v478_v27 = vmul.f32 %v477_v13, %v393_v41 }
 0x15b   : > { %v454_v24 = vadd.f32 %v453_v17, %v448_v16  ;;  %v473_v26 = vadd.f32 %v472_v21, %v467_v20  ;;  %v484_v29 = vmul.f32 %v483_v54, %v403_v1 }
 0x15c   : > { %v410_v23 = vadd.f32 %v409_v14, %v400_v15  ;;  %v435_v25 = vadd.f32 %v434_v18, %v429_v19 }
 0x15d   : > { %v460_v28 = vadd.f32 %v459_v22, %v454_v24  ;;  %v479_v30 = vadd.f32 %v478_v27, %v473_v26 }
 0x15e   : > { %411 = vst [vmem:[%s268_s28] sm:$0xff] %v410_v23  ;;  %436 = vst [vmem:[%s268_s28 + $0x8] sm:$0xff] %v435_v25 }
 0x15f   : > { %461 = vst [vmem:[%s268_s28 + $0x10] sm:$0xff] %v460_v28  ;;  %v485_v31 = vadd.f32 %v484_v29, %v479_v30 }
 0x161   : > { %486 = vst [vmem:[%s268_s28 + $0x18] sm:$0xff] %v485_v31 }
 0x162   : > { %876 = shalt.err (!%p873_p5)
}
 0x163   : > { %s877_s23 = scalar_lea.hbm %s1172_s11, 512  ;;  %s881_s14 = scalar_lea.hbm %s1227_s4, 1024 }
 0x164   : > { %p878_p9 = scmp.ne.s32.totalorder %s1172_s11, %s877_s23  ;;  %p882_p3 = scmp.lt.u32.totalorder %s1172_s11, %s1227_s4 }
 0x165   : > { %p883_p7 = scmp.lt.u32.totalorder %s881_s14, %s877_s23  ;;  %p885_p4 = scmp.lt.u32.totalorder %s877_s23, %s1172_s11 }
 0x166   : > { %p879_p1 = pnand %p878_p9, %p1086_p10 }
 0x167   : > { %p884_p13 = por %p883_p7, %p882_p3 }
 0x168   : > { %p880_p2 = pneg %p879_p1 }
 0x169   : > { %p886_p6 = por %p885_p4, %p884_p13 }
 0x16b   : > { %p887_p8 = pnand %p886_p6, %p880_p2 }
 0x16d   : > { %890 = shalt.err (!%p887_p8)
}
 0x16e   : > { %s960_s28 = smov 128   ;;  %s961_s6 = smov 8  }
 0x16f   : > { %725 = dma.vmem_to_hbm [thread:$0]  (%p1086_p10), %s1174_s8, 512, %s1172_s11, %s488_s18, %s960_s28, %s960_s28, %s961_s6  }
 0x170 PF: > { %s517_s9 = sand.u32 1, %s929_s15   ;;  %p1245_p12 = scmp.ne.s32.totalorder %s1235_s26, 0 }
 0x171   : > { %p1246_p11 = scmp.ge.s32.totalorder %s949_s20, 2  ;;  %s518_s13 = scalar_lea.sflag [#allocation4], %s517_s9 }
 0x173   : > { %p736_p0 = pnand %p1246_p11, %p1245_p12 }
 0x175   : > { %924 = dma.done.wait (!%p736_p0), %s518_s13, 512  }
 0x176   : > { %926 = vsyncadd (!%p736_p0), %s518_s13, 4294966784  ;;  %s21_s20 = sadd.s32 1, %s949_s20   ;;  %s1247_s15 = smov %s933_s16 }
 0x177   : > { %p18_p5 = scmp.ge.s32.totalorder %s21_s20, 4   ;;  %s1248_s16 = smov %s937_s17 }
 0x178   : > { %s1249_s17 = smov %s1095_s10  ;;  %s1250_s18 = smov %s945_s19 }
 0x179   : > { %s1251_s19 = smov %s1253_s5  ;;  %20 = sbr.rel (!%p18_p5) target bundleno = 7 (0x7), region = 89 }
 0x180   :  { %523 = vsyncpa [#allocation3], 1 }
 0x181   :  { %525 = vsyncpa [#allocation3 + $0x1], 1 }
 0x182   :  { %526 = vsyncpa [#allocation6], 1 }
 0x183   :  { %527 = vsyncpa [#allocation4], 1 }
 0x184   :  { %529 = vsyncpa [#allocation4 + $0x1], 1 }

</bundles_post_ra>
